<compile_context>
chip_gen: v5e
topology: v5e:2x2
jax: 0.10.0
libtpu: 0.0.40
codegen_flags: <defaults>
</compile_context>

<pallas_src>
import functools

import jax
import jax.numpy as jnp
from jax.experimental import pallas as pl
from jax.experimental.pallas import tpu as pltpu


def _round_up(v: int, m: int) -> int:
    return ((v + m - 1) // m) * m


def _vmem_limit_bytes() -> int:
    default = 64 * 1024 * 1024
    try:
        cap = getattr(pltpu.get_tpu_info(), "vmem_capacity_bytes", None)
        if not cap:
            return default
        return int(cap * 0.82)   # ~52 MiB on v7x (64 MiB/TC), ~105 MiB on v5e/v6e (128 MiB)
    except Exception:
        return default


def _triplet_kernel(x_row_ref, xt_ref, sq_row_ref, sq_col_ref, t_col_ref, t_row_ref,
                    out_ref, run_ap_ref, run_an_ref, *,
                    margin: float, cast_bf16: bool):
    # x_row_ref : (TM, Dp)  native dtype anchor tile (constant along the column axis)
    # xt_ref    : (Dp, TN)  native dtype column tile of x^T
    # sq_row_ref: (TM, 1)   f32 squared norms of the anchor rows
    # sq_col_ref: (1, TN)   f32 squared norms of the column tile (padded cols hold 3e38)
    # t_col_ref : (TM, 1)   int32 labels of anchor rows (padded rows are -1)
    # t_row_ref : (1, TN)   int32 labels of the column tile (padded cols are -1)
    # out_ref   : (1, 8, 128) f32 per-row-tile partial loss sum (lane-dense tile)
    # run_ap/run_an: (TM, 1) f32 VMEM scratch carrying the running hard-pos max /
    #                hard-neg min of m = sq_col - 2*gram (sq_row added at finalize).
    j = pl.program_id(1)

    @pl.when(j == 0)
    def _():
        run_ap_ref[...] = jnp.full(run_ap_ref.shape, -jnp.inf, jnp.float32)
        run_an_ref[...] = jnp.full(run_an_ref.shape, jnp.inf, jnp.float32)

    lhs = x_row_ref[...]
    rhs = xt_ref[...]
    if cast_bf16:
        lhs = lhs.astype(jnp.bfloat16)
        rhs = rhs.astype(jnp.bfloat16)

    # (-2) folded into the (TM, Dp) LHS (cheaper than scaling the (TM, TN) gram whenever
    # N > D, hidden under the matmul either way).  MXU matmul, f32 accumulation.
    gram_m2 = jnp.dot(lhs * (-2.0), rhs, preferred_element_type=jnp.float32)   # (TM, TN)

    # m = ||b||^2 - 2 a.b  (== squared distance minus the row norm, which is hoisted).
    m = sq_col_ref[...] + gram_m2                                              # (TM, TN)

    pos = t_col_ref[...] == t_row_ref[...]                                     # (TM, TN)
    # Padded columns: label -1 never matches a real anchor (so never positive), and their
    # huge sq_col means they can never win the negative min -> no col_valid mask needed.
    tile_ap = jnp.max(jnp.where(pos, m, -jnp.inf), axis=1, keepdims=True)      # (TM, 1)
    tile_an = jnp.min(jnp.where(pos, jnp.inf, m), axis=1, keepdims=True)       # (TM, 1)

    run_ap_ref[...] = jnp.maximum(run_ap_ref[...], tile_ap)
    run_an_ref[...] = jnp.minimum(run_an_ref[...], tile_an)

    @pl.when(j == pl.num_programs(1) - 1)
    def _():
        sq_row = sq_row_ref[...]
        # clamp(min=1e-12).sqrt() applied only to the reduced vectors (2*TM sqrts/tile).
        d_ap = jnp.sqrt(jnp.maximum(run_ap_ref[...] + sq_row, 1e-12))
        d_an = jnp.sqrt(jnp.maximum(run_an_ref[...] + sq_row, 1e-12))

        if margin == 0.0:
            # nn.SoftMarginLoss()(d_an - d_ap, 1) = mean(log1p(exp(-(d_an - d_ap))))
            # computed as a numerically stable softplus(d_ap - d_an).
            z = d_ap - d_an
            per = jnp.maximum(z, 0.0) + jnp.log1p(jnp.exp(-jnp.abs(z)))
        else:
            # nn.MarginRankingLoss(margin)(d_an, d_ap, 1) = mean(max(0, d_ap - d_an + margin))
            per = jnp.maximum(d_ap - d_an + margin, 0.0)

        row_valid = t_col_ref[...] >= 0
        partial = jnp.sum(jnp.where(row_valid, per, 0.0))
        out_ref[...] = jnp.full((1, 8, 128), partial, dtype=jnp.float32)


def triplet_loss(inputs: jax.Array, targets: jax.Array, margin: float = 0.3,
                 use_bf16_matmul: bool = False) -> jax.Array:
    """inputs: (N, D) float features; targets: (N,) int labels. Returns scalar f32 loss."""
    n, d = inputs.shape
    itemsize = inputs.dtype.itemsize
    sub = max(8, 32 // max(itemsize, 1))   # sublane pack: 8 (f32), 16 (bf16), 32 (int8/fp8)

    if n <= 128:
        # Tiny-N regime: a single grid point, no tiling overhead.
        tm = _round_up(max(n, 1), sub)
        tn = tm
        n_pad = tm
    else:
        tm = 128
        tn = 128 if n <= 1024 else 512      # bigger column tiles once padding amortizes
        n_pad = _round_up(n, max(tm, tn))
    d_pad = _round_up(d, 128)
    g_rows = n_pad // tm
    g_cols = n_pad // tn

    x = inputs
    if (n_pad, d_pad) != (n, d):
        x = jnp.pad(x, ((0, n_pad - n), (0, d_pad - d)))
    t = targets.astype(jnp.int32)
    if n_pad != n:
        t = jnp.pad(t, (0, n_pad - n), constant_values=-1)

    # Layout plumbing in XLA (cheap relative to the kernel): transposed features and both
    # layouts of norms/labels, so the kernel never transposes on the XLU.
    xt = x.T                                                       # (Dp, Np), native dtype
    xf = x.astype(jnp.float32)
    sq = jnp.sum(xf * xf, axis=1)                                  # (Np,) f32
    sq_row = sq.reshape(n_pad, 1)
    # Padded columns get a huge norm so they can never win the hard-negative min.
    sq_col = jnp.where(t >= 0, sq, jnp.float32(3.0e38)).reshape(1, n_pad)
    t_col = t.reshape(n_pad, 1)
    t_row = t.reshape(1, n_pad)

    cast_bf16 = bool(use_bf16_matmul) and x.dtype == jnp.float32

    flops = 2 * n_pad * n_pad * d_pad
    transcendentals = (2 + (2 if margin == 0.0 else 0)) * n_pad      # sqrts (+ exp/log1p)
    bytes_accessed = (n_pad * d_pad * itemsize                       # anchor rows (once)
                      + g_rows * n_pad * d_pad * itemsize            # x^T re-read per row tile
                      + (g_rows + 1) * n_pad * 4 * 3                 # norms + labels
                      + g_rows * 8 * 128 * 4)                        # output tiles
    cost = pl.CostEstimate(flops=int(flops), transcendentals=int(transcendentals),
                           bytes_accessed=int(bytes_accessed))

    kernel = functools.partial(_triplet_kernel, margin=float(margin), cast_bf16=cast_bf16)
    out = pl.pallas_call(
        kernel,
        out_shape=jax.ShapeDtypeStruct((g_rows, 8, 128), jnp.float32),
        grid=(g_rows, g_cols),
        in_specs=[
            pl.BlockSpec((tm, d_pad), lambda i, j: (i, 0)),    # anchor row tile
            pl.BlockSpec((d_pad, tn), lambda i, j: (0, j)),    # x^T column tile
            pl.BlockSpec((tm, 1), lambda i, j: (i, 0)),        # row norms (row layout)
            pl.BlockSpec((1, tn), lambda i, j: (0, j)),        # col norms (lane layout)
            pl.BlockSpec((tm, 1), lambda i, j: (i, 0)),        # labels (row layout)
            pl.BlockSpec((1, tn), lambda i, j: (0, j)),        # labels (lane layout)
        ],
        out_specs=pl.BlockSpec((1, 8, 128), lambda i, j: (i, 0, 0)),
        scratch_shapes=[pltpu.VMEM((tm, 1), jnp.float32),      # running hard-pos max
                        pltpu.VMEM((tm, 1), jnp.float32)],     # running hard-neg min
        compiler_params=pltpu.CompilerParams(
            dimension_semantics=("parallel", "arbitrary"),     # rows megacore, cols reduce
            vmem_limit_bytes=_vmem_limit_bytes(),
        ),
        cost_estimate=cost,
    )(x, xt, sq_row, sq_col, t_col, t_row)

    return jnp.sum(out[:, 0, 0]) / jnp.float32(n)


def _reference(inputs, targets, margin=0.3):
    # Pure-JAX reference of the PyTorch forward for a sanity check.
    x = inputs.astype(jnp.float32)
    sq = jnp.sum(x * x, axis=1, keepdims=True)
    dist = jnp.sqrt(jnp.maximum(sq + sq.T - 2.0 * (x @ x.T), 1e-12))
    mask = targets[:, None] == targets[None, :]
    dist_ap = jnp.max(jnp.where(mask, dist, -jnp.inf), axis=1)
    dist_an = jnp.min(jnp.where(mask, jnp.inf, dist), axis=1)
    if margin == 0.0:
        return jnp.mean(jax.nn.softplus(dist_ap - dist_an))
    return jnp.mean(jnp.maximum(dist_ap - dist_an + margin, 0.0))


if __name__ == "__main__":
    key = jax.random.PRNGKey(0)

    # Case 1: margin ranking loss, N already a multiple of 8, single grid point.
    n, d = 8, 32
    inputs = jax.random.normal(key, (n, d), dtype=jnp.float32)
    targets = jnp.array([0, 0, 1, 1, 2, 2, 3, 3], dtype=jnp.int32)
    loss = triplet_loss(inputs, targets, margin=0.3)
    jax.block_until_ready(loss)
    ref = _reference(inputs, targets, margin=0.3)
    assert jnp.allclose(loss, ref, atol=1e-5, rtol=1e-5), (loss, ref)

    # Case 2: soft-margin path (margin=0.0) with N that needs row/column padding.
    n2, d2 = 6, 32
    inputs2 = jax.random.normal(jax.random.PRNGKey(1), (n2, d2), dtype=jnp.float32)
    targets2 = jnp.array([0, 0, 1, 1, 2, 2], dtype=jnp.int32)
    loss2 = triplet_loss(inputs2, targets2, margin=0.0)
    jax.block_until_ready(loss2)
    ref2 = _reference(inputs2, targets2, margin=0.0)
    assert jnp.allclose(loss2, ref2, atol=1e-5, rtol=1e-5), (loss2, ref2)

    # Case 3: exercises the column-tiled flash-style path (multiple row and column tiles,
    # padded rows/columns with the huge-sq_col trick).
    n3, d3 = 300, 64
    inputs3 = jax.random.normal(jax.random.PRNGKey(2), (n3, d3), dtype=jnp.float32)
    targets3 = jax.random.randint(jax.random.PRNGKey(3), (n3,), 0, 10, dtype=jnp.int32)
    loss3 = triplet_loss(inputs3, targets3, margin=0.3)
    jax.block_until_ready(loss3)
    ref3 = _reference(inputs3, targets3, margin=0.3)
    assert jnp.allclose(loss3, ref3, atol=1e-4, rtol=1e-4), (loss3, ref3)

    print("KERNEL_OK")
</pallas_src>

<mosaic_0001>
module attributes {stable_mosaic.version = 11 : i64} {
  func.func @_triplet_kernel(%arg0: i32, %arg1: i32, %arg2: memref<8x128xf32, #tpu.memory_space<vmem>>, %arg3: memref<128x8xf32, #tpu.memory_space<vmem>>, %arg4: memref<8x1xf32, #tpu.memory_space<vmem>>, %arg5: memref<1x8xf32, #tpu.memory_space<vmem>>, %arg6: memref<8x1xi32, #tpu.memory_space<vmem>>, %arg7: memref<1x8xi32, #tpu.memory_space<vmem>>, %arg8: memref<1x8x128xf32, #tpu.memory_space<vmem>>, %arg9: memref<8x1xf32, #tpu.memory_space<vmem>>, %arg10: memref<8x1xf32, #tpu.memory_space<vmem>>) attributes {dimension_semantics = [#tpu.dimension_semantics<parallel>, #tpu.dimension_semantics<arbitrary>], iteration_bounds = array<i64: 1, 1>, scalar_prefetch = 0 : i64, scratch_operands = 2 : i64, tpu.core_type = #tpu.core_type<tc>, window_params = [{transform_indices = @transform_0, window_bounds = array<i64: 8, 128>}, {transform_indices = @transform_1, window_bounds = array<i64: 128, 8>}, {transform_indices = @transform_2, window_bounds = array<i64: 8, 1>}, {transform_indices = @transform_3, window_bounds = array<i64: 1, 8>}, {transform_indices = @transform_4, window_bounds = array<i64: 8, 1>}, {transform_indices = @transform_5, window_bounds = array<i64: 1, 8>}, {transform_indices = @transform_6, window_bounds = array<i64: 1, 8, 128>}]} {
    %c0_i32 = arith.constant 0 : i32
    %0 = arith.cmpi eq, %arg1, %c0_i32 : i32
    %1 = arith.extui %0 : i1 to i32
    %c0_i32_0 = arith.constant 0 : i32
    %2 = arith.cmpi ne, %1, %c0_i32_0 : i32
    scf.if %2 {
      %cst_25 = arith.constant 0xFF800000 : f32
      %33 = vector.broadcast %cst_25 : f32 to vector<8x1xf32>
      %c0_26 = arith.constant 0 : index
      %c0_27 = arith.constant 0 : index
      %34 = vector.load %arg9[%c0_26, %c0_27] : memref<8x1xf32, #tpu.memory_space<vmem>>, vector<8x1xf32>
      tpu.vector_store %arg9[%c0_26, %c0_27], %33 {strides = array<i32>} : memref<8x1xf32, #tpu.memory_space<vmem>>, vector<8x1xf32>,
      %cst_28 = arith.constant 0x7F800000 : f32
      %35 = vector.broadcast %cst_28 : f32 to vector<8x1xf32>
      %c0_29 = arith.constant 0 : index
      %c0_30 = arith.constant 0 : index
      %36 = vector.load %arg10[%c0_29, %c0_30] : memref<8x1xf32, #tpu.memory_space<vmem>>, vector<8x1xf32>
      tpu.vector_store %arg10[%c0_29, %c0_30], %35 {strides = array<i32>} : memref<8x1xf32, #tpu.memory_space<vmem>>, vector<8x1xf32>,
    } else {
    }
    %c0 = arith.constant 0 : index
    %c0_1 = arith.constant 0 : index
    %3 = vector.load %arg2[%c0, %c0_1] : memref<8x128xf32, #tpu.memory_space<vmem>>, vector<8x128xf32>
    %c0_2 = arith.constant 0 : index
    %c0_3 = arith.constant 0 : index
    %4 = vector.load %arg3[%c0_2, %c0_3] : memref<128x8xf32, #tpu.memory_space<vmem>>, vector<128x8xf32>
    %cst = arith.constant -2.000000e+00 : f32
    %5 = vector.broadcast %cst : f32 to vector<8x128xf32>
    %6 = arith.mulf %3, %5 : vector<8x128xf32>
    %cst_4 = arith.constant dense<0.000000e+00> : vector<8x8xf32>
    %7 = tpu.matmul %6, %4, %cst_4 {dimension_numbers = #tpu.dot_dimension_numbers<[1], [0], [0], [1], [0, 0, 1, 1], [], []>} : vector<8x128xf32>, vector<128x8xf32>, vector<8x8xf32> -> vector<8x8xf32>
    %c0_5 = arith.constant 0 : index
    %c0_6 = arith.constant 0 : index
    %8 = vector.load %arg5[%c0_5, %c0_6] : memref<1x8xf32, #tpu.memory_space<vmem>>, vector<1x8xf32>
    %9 = vector.broadcast %8 : vector<1x8xf32> to vector<8x8xf32>
    %10 = arith.addf %9, %7 : vector<8x8xf32>
    %c0_7 = arith.constant 0 : index
    %c0_8 = arith.constant 0 : index
    %11 = vector.load %arg6[%c0_7, %c0_8] : memref<8x1xi32, #tpu.memory_space<vmem>>, vector<8x1xi32>
    %c0_9 = arith.constant 0 : index
    %c0_10 = arith.constant 0 : index
    %12 = vector.load %arg7[%c0_9, %c0_10] : memref<1x8xi32, #tpu.memory_space<vmem>>, vector<1x8xi32>
    %13 = vector.broadcast %11 : vector<8x1xi32> to vector<8x8xi32>
    %14 = vector.broadcast %12 : vector<1x8xi32> to vector<8x8xi32>
    %15 = arith.cmpi eq, %13, %14 : vector<8x8xi32>
    %cst_11 = arith.constant 0xFF800000 : f32
    %16 = vector.broadcast %cst_11 : f32 to vector<8x8xf32>
    %17 = arith.select %15, %10, %16 : vector<8x8xi1>, vector<8x8xf32>
    %cst_12 = arith.constant dense<0xFF800000> : vector<8xf32>
    %18 = vector.multi_reduction <maximumf>, %17, %cst_12 [1] : vector<8x8xf32> to vector<8xf32>
    %19 = vector.shape_cast %18 : vector<8xf32> to vector<8x1xf32>
    %cst_13 = arith.constant 0x7F800000 : f32
    %20 = vector.broadcast %cst_13 : f32 to vector<8x8xf32>
    %21 = arith.select %15, %20, %10 : vector<8x8xi1>, vector<8x8xf32>
    %cst_14 = arith.constant dense<0x7F800000> : vector<8xf32>
    %22 = vector.multi_reduction <minimumf>, %21, %cst_14 [1] : vector<8x8xf32> to vector<8xf32>
    %23 = vector.shape_cast %22 : vector<8xf32> to vector<8x1xf32>
    %c0_15 = arith.constant 0 : index
    %c0_16 = arith.constant 0 : index
    %24 = vector.load %arg9[%c0_15, %c0_16] : memref<8x1xf32, #tpu.memory_space<vmem>>, vector<8x1xf32>
    %25 = arith.maximumf %24, %19 : vector<8x1xf32>
    %c0_17 = arith.constant 0 : index
    %c0_18 = arith.constant 0 : index
    %26 = vector.load %arg9[%c0_17, %c0_18] : memref<8x1xf32, #tpu.memory_space<vmem>>, vector<8x1xf32>
    tpu.vector_store %arg9[%c0_17, %c0_18], %25 {strides = array<i32>} : memref<8x1xf32, #tpu.memory_space<vmem>>, vector<8x1xf32>,
    %c0_19 = arith.constant 0 : index
    %c0_20 = arith.constant 0 : index
    %27 = vector.load %arg10[%c0_19, %c0_20] : memref<8x1xf32, #tpu.memory_space<vmem>>, vector<8x1xf32>
    %28 = arith.minimumf %27, %23 : vector<8x1xf32>
    %c0_21 = arith.constant 0 : index
    %c0_22 = arith.constant 0 : index
    %29 = vector.load %arg10[%c0_21, %c0_22] : memref<8x1xf32, #tpu.memory_space<vmem>>, vector<8x1xf32>
    tpu.vector_store %arg10[%c0_21, %c0_22], %28 {strides = array<i32>} : memref<8x1xf32, #tpu.memory_space<vmem>>, vector<8x1xf32>,
    %c0_i32_23 = arith.constant 0 : i32
    %30 = arith.cmpi eq, %arg1, %c0_i32_23 : i32
    %31 = arith.extui %30 : i1 to i32
    %c0_i32_24 = arith.constant 0 : i32
    %32 = arith.cmpi ne, %31, %c0_i32_24 : i32
    scf.if %32 {
      %c0_25 = arith.constant 0 : index
      %c0_26 = arith.constant 0 : index
      %33 = vector.load %arg4[%c0_25, %c0_26] : memref<8x1xf32, #tpu.memory_space<vmem>>, vector<8x1xf32>
      %c0_27 = arith.constant 0 : index
      %c0_28 = arith.constant 0 : index
      %34 = vector.load %arg9[%c0_27, %c0_28] : memref<8x1xf32, #tpu.memory_space<vmem>>, vector<8x1xf32>
      %35 = arith.addf %34, %33 : vector<8x1xf32>
      %cst_29 = arith.constant 9.99999996E-13 : f32
      %36 = vector.broadcast %cst_29 : f32 to vector<8x1xf32>
      %37 = arith.maximumf %35, %36 : vector<8x1xf32>
      %38 = math.sqrt %37 : vector<8x1xf32>
      %c0_30 = arith.constant 0 : index
      %c0_31 = arith.constant 0 : index
      %39 = vector.load %arg10[%c0_30, %c0_31] : memref<8x1xf32, #tpu.memory_space<vmem>>, vector<8x1xf32>
      %40 = arith.addf %39, %33 : vector<8x1xf32>
      %cst_32 = arith.constant 9.99999996E-13 : f32
      %41 = vector.broadcast %cst_32 : f32 to vector<8x1xf32>
      %42 = arith.maximumf %40, %41 : vector<8x1xf32>
      %43 = math.sqrt %42 : vector<8x1xf32>
      %44 = arith.subf %38, %43 : vector<8x1xf32>
      %cst_33 = arith.constant 3.000000e-01 : f32
      %45 = vector.broadcast %cst_33 : f32 to vector<8x1xf32>
      %46 = arith.addf %44, %45 : vector<8x1xf32>
      %cst_34 = arith.constant 0.000000e+00 : f32
      %47 = vector.broadcast %cst_34 : f32 to vector<8x1xf32>
      %48 = arith.maximumf %46, %47 : vector<8x1xf32>
      %c0_35 = arith.constant 0 : index
      %c0_36 = arith.constant 0 : index
      %49 = vector.load %arg6[%c0_35, %c0_36] : memref<8x1xi32, #tpu.memory_space<vmem>>, vector<8x1xi32>
      %c0_i32_37 = arith.constant 0 : i32
      %50 = vector.broadcast %c0_i32_37 : i32 to vector<8x1xi32>
      %51 = arith.cmpi sge, %49, %50 : vector<8x1xi32>
      %cst_38 = arith.constant 0.000000e+00 : f32
      %52 = vector.broadcast %cst_38 : f32 to vector<8x1xf32>
      %53 = arith.select %51, %48, %52 : vector<8x1xi1>, vector<8x1xf32>
      %54 = vector.shape_cast %53 : vector<8x1xf32> to vector<1x8x1xf32>
      %cst_39 = arith.constant dense<0.000000e+00> : vector<1xf32>
      %55 = vector.multi_reduction <add>, %54, %cst_39 [1, 2] : vector<1x8x1xf32> to vector<1xf32>
      %56 = vector.shape_cast %55 : vector<1xf32> to vector<1x1x1xf32>
      %57 = vector.extract %56[0, 0, 0] : f32 from vector<1x1x1xf32>
      %58 = vector.broadcast %57 : f32 to vector<1x8x128xf32>
      %c0_40 = arith.constant 0 : index
      %c0_41 = arith.constant 0 : index
      %c0_42 = arith.constant 0 : index
      %59 = vector.load %arg8[%c0_40, %c0_41, %c0_42] : memref<1x8x128xf32, #tpu.memory_space<vmem>>, vector<1x8x128xf32>
      tpu.vector_store %arg8[%c0_40, %c0_41, %c0_42], %58 {strides = array<i32>} : memref<1x8x128xf32, #tpu.memory_space<vmem>>, vector<1x8x128xf32>,
    } else {
    }
    return
  }
  func.func @transform_0(%arg0: i32, %arg1: i32) -> (i32, i32) {
    %c0_i32 = arith.constant 0 : i32
    %c0_i32_0 = arith.constant 0 : i32
    return %arg0, %c0_i32 : i32, i32
  }
  func.func @transform_1(%arg0: i32, %arg1: i32) -> (i32, i32) {
    %c0_i32 = arith.constant 0 : i32
    %c0_i32_0 = arith.constant 0 : i32
    return %c0_i32, %arg1 : i32, i32
  }
  func.func @transform_2(%arg0: i32, %arg1: i32) -> (i32, i32) {
    %c0_i32 = arith.constant 0 : i32
    %c0_i32_0 = arith.constant 0 : i32
    return %arg0, %c0_i32 : i32, i32
  }
  func.func @transform_3(%arg0: i32, %arg1: i32) -> (i32, i32) {
    %c0_i32 = arith.constant 0 : i32
    %c0_i32_0 = arith.constant 0 : i32
    return %c0_i32, %arg1 : i32, i32
  }
  func.func @transform_4(%arg0: i32, %arg1: i32) -> (i32, i32) {
    %c0_i32 = arith.constant 0 : i32
    %c0_i32_0 = arith.constant 0 : i32
    return %arg0, %c0_i32 : i32, i32
  }
  func.func @transform_5(%arg0: i32, %arg1: i32) -> (i32, i32) {
    %c0_i32 = arith.constant 0 : i32
    %c0_i32_0 = arith.constant 0 : i32
    return %c0_i32, %arg1 : i32, i32
  }
  func.func @transform_6(%arg0: i32, %arg1: i32) -> (i32, i32, i32) {
    %c0_i32 = arith.constant 0 : i32
    %c0_i32_0 = arith.constant 0 : i32
    %c0_i32_1 = arith.constant 0 : i32
    return %arg0, %c0_i32, %c0_i32_0 : i32, i32, i32
  }
}

</mosaic_0001>

<bundles_post_ra>
// kernel: tpu_custom_call.1
= control target key start
LH: loop header
LB: loop body
LE: loop exit
PB: predicated region body
PF: predicated region fallthrough
CT: control target
= control target key end

     0   :  { %v204_v2 = vmov 0   ;;  %s318_s0 = inlined_call_operand.vmem [shape: f32[8,128], index: 0, kind: input, shape index: {}]   ;;  %s319_s1 = inlined_call_operand.vmem [shape: f32[128,8], index: 1, kind: input, shape index: {}]   ;;  %s320_s2 = inlined_call_operand.vmem [shape: f32[8,1], index: 2, kind: input, shape index: {}]   ;;  %s321_s3 = inlined_call_operand.vmem [shape: f32[1,8], index: 3, kind: input, shape index: {}]   ;;  %s322_s4 = inlined_call_operand.vmem [shape: s32[8,1], index: 4, kind: input, shape index: {}]   ;;  %s323_s5 = inlined_call_operand.vmem [shape: s32[1,8], index: 5, kind: input, shape index: {}]   ;;  %s324_s6 = inlined_call_operand.hbm [shape: f32[1,8,128], index: 6, kind: output, shape index: {}]  }
   0x1   :  { %v47_v0 = vld [vmem:[%s319_s1 + $0x78] sm:$0xff]  ;;  %v46_v1 = vld [vmem:[%s319_s1 + $0x70] sm:$0xff]  ;;  %171 = vset.pattern.permute.xlu0 %v204_v2  ;;  %v45_v3 = vld [vmem:[%s319_s1 + $0x68] sm:$0xff] }
   0x2   :  { %49 = vmatpush.msra.mxu0 %v47_v0  ;;  %v44_v4 = vld [vmem:[%s319_s1 + $0x60] sm:$0xff]  ;;  %v43_v6 = vld [vmem:[%s319_s1 + $0x58] sm:$0xff] }
   0x3   :  { %v258_v5 = vld [vmem:[%s322_s4] sm:$0xff] }
   0x4   :  { %50 = vmatpush.msra.mxu0 %v46_v1  ;;  %77 = vperm.xlu0 %171, %v258_v5  }
   0x6   :  { %51 = vmatpush.msra.mxu0 %v45_v3 }
   0x8   :  { %52 = vmatpush.msra.mxu0 %v44_v4 }
   0x9   :  { %11 = vsyncpa [#allocation5], 0  ;;  %v42_v7 = vld [vmem:[%s319_s1 + $0x50] sm:$0xff]  ;;  %v41_v8 = vld [vmem:[%s319_s1 + $0x48] sm:$0xff]  ;;  %vm82_vm1 = vcmask 64512   ;;  %vm28_vm2 = vcmask 7168  }
   0xa   :  { %53 = vmatpush.msra.mxu0 %v43_v6  ;;  %v40_v9 = vld [vmem:[%s319_s1 + $0x40] sm:$0xff]  ;;  %v39_v10 = vld [vmem:[%s319_s1 + $0x38] sm:$0xff]  ;;  %v38_v11 = vld [vmem:[%s319_s1 + $0x30] sm:$0xff]  ;;  %v205_v29 = vmov inf   ;;  %v206_v30 = vmov -inf   ;;  %vm135_vm7 = vcmp.ge.s32.totalorder %v258_v5, 0 }
   0xb   :  { %v37_v12 = vld [vmem:[%s319_s1 + $0x28] sm:$0xff]  ;;  %v36_v13 = vld [vmem:[%s319_s1 + $0x20] sm:$0xff]  ;;  %v35_v14 = vld [vmem:[%s319_s1 + $0x18] sm:$0xff]  ;;  %30 = vst.msk [vmem:[#allocation3] sm:$0xff] %vm28_vm2, %v205_v29  ;;  %s156_s4 = sshll.u32 %s324_s6, 4  ;;  %s157_s4 = int_to_ptr.hbm [resolvable:$true] %s156_s4 }
   0xc   :  { %54 = vmatpush.msra.mxu0 %v42_v7  ;;  %v34_v15 = vld [vmem:[%s319_s1 + $0x10] sm:$0xff]  ;;  %v31_v16 = vld [vmem:[%s318_s0] sm:$0xff]  ;;  %v33_v17 = vld [vmem:[%s319_s1 + $0x8] sm:$0xff]  ;;  %29 = vst.msk [vmem:[#allocation2] sm:$0xff] %vm28_vm2, %v206_v30 }
   0xd   :  { %v32_v18 = vld [vmem:[%s319_s1] sm:$0xff]  ;;  %v48_v19 = vmul.f32 -2.0, %v31_v16 }
   0xe   :  { %55 = vmatpush.msra.mxu0 %v41_v8  ;;  %v173_v20 = vld [vmem:[%s323_s5] ss:$0 sm:$0xff] }
   0xf   :  { %v172_v21 = vld [vmem:[%s321_s3] ss:$0 sm:$0xff] }
  0x10   :  { %56 = vmatpush.msra.mxu0 %v40_v9  ;;  %v100_v37 = vld [vmem:[%s320_s2] sm:$0xff]  ;;  %s207_s2 = smov [#allocation4]  }
  0x11   :  { %s154_s3 = sshll.u32 %s207_s2, 4  ;;  %s155_s3 = int_to_ptr.vmem [resolvable:$true] %s154_s3 }
  0x12   :  { %57 = vmatpush.msra.mxu0 %v39_v10  ;;  %v94_v31 = vld [vmem:[#allocation3] sm:$0xff] }
  0x13   :  { %v90_v32 = vld [vmem:[#allocation2] sm:$0xff] }
  0x14   :  { %58 = vmatpush.msra.mxu0 %v38_v11 }
  0x16   :  { %59 = vmatpush.msra.mxu0 %v37_v12 }
  0x18   :  { %60 = vmatpush.msra.mxu0 %v36_v13 }
  0x1a   :  { %61 = vmatpush.msra.mxu0 %v35_v14 }
  0x1c   :  { %62 = vmatpush.msra.mxu0 %v34_v15 }
  0x1e   :  { %63 = vmatpush.msra.mxu0 %v33_v17 }
  0x20   :  { %64 = vmatpush.msra.mxu0 %v32_v18 }
  0x21   :  { %65 = vmatmul.f32.vlgmr.msra.gmra.mxu0 %v48_v19 }
  0x76   :  { %v78_v22 = vpop.permute.xlu0 %77 }
  0x77   :  { %vm80_vm0 = vcmp.eq.s32.totalorder %v78_v22, %v173_v20 }
  0x9e   :  { %v66_v23 = vpop.f32.mrf.mxu0 }
  0x9f   :  { %v73_v24 = vadd.f32 %v172_v21, %v66_v23 }
  0xa1   :  { %v86_v25 = vsel %vm80_vm0, inf, %v73_v24  ;;  %v81_v26 = vsel %vm80_vm0, %v73_v24, -inf }
  0xa2   :  { %v87_v27 = vsel %vm82_vm1, %v86_v25, inf  ;;  %v83_v28 = vsel %vm82_vm1, %v81_v26, -inf }
  0xa3   :  { %88 = vmin.xlane.f32.xlu1 %v87_v27  ;;  %84 = vmax.xlane.f32.xlu0 %v83_v28 }
 0x116   :  { %v89_v33 = vpop.xlane.xlu1 %88  ;;  %v85_v34 = vpop.xlane.xlu0 %84 }
 0x117   :  { %v95_v35 = vmin.f32 %v94_v31, %v89_v33  ;;  %v91_v36 = vmax.f32 %v90_v32, %v85_v34 }
 0x119   :  { %96 = vst.msk [vmem:[#allocation3] sm:$0xff] %vm28_vm2, %v95_v35 }
 0x11a   :  { %93 = vst.msk [vmem:[#allocation2] sm:$0xff] %vm28_vm2, %v91_v36 }
 0x120   :  { %v116_v38 = vld [vmem:[#allocation3] sm:$0xff] }
 0x121   :  { %v101_v39 = vld [vmem:[#allocation2] sm:$0xff]  ;;  %v117_v40 = vadd.f32 %v116_v38, %v100_v37 }
 0x122   :  { %v102_v41 = vadd.f32 %v101_v39, %v100_v37 }
 0x123   :  { %v118_v42 = vmax.f32 %v117_v40, 1e-12 }
 0x124   :  { %v103_v43 = vmax.f32 %v102_v41, 1e-12 }
 0x125   :  { %174 = vrsqrt.f32 %v118_v42  ;;  %vm126_vm3 = vcmp.eq.f32.partialorder %v118_v42, inf  ;;  %v129_v58 = vand.u32 2147483648, %v118_v42  ;;  %vm128_vm5 = vcmp.eq.f32.partialorder %v118_v42, 0.0 }
 0x126   :  { %176 = vrsqrt.f32 %v103_v43  ;;  %vm111_vm4 = vcmp.eq.f32.partialorder %v103_v43, inf  ;;  %v114_v59 = vand.u32 2147483648, %v103_v43  ;;  %vm113_vm6 = vcmp.eq.f32.partialorder %v103_v43, 0.0 }
 0x12b   :  { %v175_v44 = vpop.eup %174 }
 0x12c   :  { %v177_v45 = vpop.eup %176  ;;  %v120_v46 = vmul.f32 %v175_v44, %v118_v42 }
 0x12d   :  { %v105_v47 = vmul.f32 %v177_v45, %v103_v43 }
 0x12e   :  { %v121_v48 = vmul.f32 %v175_v44, %v120_v46 }
 0x12f   :  { %v106_v49 = vmul.f32 %v177_v45, %v105_v47 }
 0x130   :  { %v122_v50 = vmul.f32 0.5, %v121_v48 }
 0x131   :  { %v107_v51 = vmul.f32 0.5, %v106_v49 }
 0x132   :  { %v123_v52 = vsub.f32 1.5, %v122_v50 }
 0x133   :  { %v108_v53 = vsub.f32 1.5, %v107_v51 }
 0x134   :  { %v124_v54 = vmul.f32 %v175_v44, %v123_v52 }
 0x135   :  { %v109_v55 = vmul.f32 %v177_v45, %v108_v53 }
 0x136   :  { %v125_v56 = vmul.f32 %v124_v54, %v118_v42 }
 0x137   :  { %v110_v57 = vmul.f32 %v109_v55, %v103_v43 }
 0x138   :  { %v127_v60 = vsel %vm126_vm3, %v118_v42, %v125_v56 }
 0x139   :  { %v112_v61 = vsel %vm111_vm4, %v103_v43, %v110_v57  ;;  %v130_v62 = vsel %vm128_vm5, %v129_v58, %v127_v60 }
 0x13a   :  { %v115_v63 = vsel %vm113_vm6, %v114_v59, %v112_v61 }
 0x13b   :  { %v131_v0 = vsub.f32 %v115_v63, %v130_v62 }
 0x13d   :  { %v132_v1 = vadd.f32 0.3, %v131_v0 }
 0x13f   :  { %v133_v2 = vmax.f32 %v132_v1, 0.0 }
 0x141   :  { %v136_v3 = vsel %vm135_vm7, %v133_v2, 0.0 }
 0x142   :  { %v137_v4 = vsel %vm28_vm2, %v136_v3, 0.0 }
 0x143   :  { %138 = vadd.xlane.f32.xlu1 %v137_v4 }
 0x1b6   :  { %v139_v6 = vpop.xlane.xlu1 %138 }
 0x1b7   :  { %v140_v7 = vrot.slane %v139_v6, 4 }
 0x1b9   :  { %v141_v8 = vadd.f32 %v140_v7, %v139_v6 }
 0x1bb   :  { %v142_v9 = vrot.slane %v141_v8, 2 }
 0x1bd   :  { %v143_v10 = vadd.f32 %v142_v9, %v141_v8 }
 0x1bf   :  { %v144_v11 = vrot.slane %v143_v10, 1 }
 0x1c1   :  { %v145_v12 = vadd.f32 %v144_v11, %v143_v10 }
 0x1c3   :  { %165 = vpush %v145_v12 }
 0x1f4   :  { %s166_s13 = spop %165 }
 0x1f5   :  { %v147_v5 = vstv %s166_s13 }
 0x1f6   :  { %148 = vst [vmem:[#allocation4] sm:$0xff] %v147_v5 }
 0x1f7   :  { %159 = dma.vmem_to_hbm [thread:$0]  %s155_s3, 128, %s157_s4, [#allocation5]  }
 0x1f8   :  { %202 = dma.done.wait [#allocation5], 128  }
 0x1f9   :  { %203 = vsyncadd [#allocation5], 4294967168 }
 0x1fa   :  { %164 = vsyncpa [#allocation5], 1 }

</bundles_post_ra>
